<compile_context>
chip_gen: v7x
topology: tpu7x:2x2x1
jax: 0.10.0
libtpu: 0.0.40
codegen_flags: <defaults>
</compile_context>

<pallas_src>
import functools

import jax
import jax.numpy as jnp
from jax.experimental import pallas as pl
from jax.experimental.pallas import tpu as pltpu


_LANE_CANDIDATES = (1024, 512, 256, 128)  # lane-dense widths, largest first


def _round_up(x: int, m: int) -> int:
    return (x + m - 1) // m * m


def _satlu_math(x, *, act: str, pixel_max: float):
    """Elementwise SatLU math; used on kernel tiles and on the jnp tail."""
    if act == "hardtanh":
        # Clamp in native dtype (bf16-native VALU on v6e/v7x). Note: if
        # pixel_max is not exactly representable in bf16 the threshold differs
        # from an f32 clamp by 1 ulp; benign, but intentional.
        lo = jnp.asarray(0, dtype=x.dtype)
        hi = jnp.asarray(pixel_max, dtype=x.dtype)
        return jnp.clip(x, lo, hi)

    # Transcendental modes: bf16 inputs compute in bf16, everything else in f32.
    cdt = x.dtype if x.dtype == jnp.bfloat16 else jnp.float32
    xf = x.astype(cdt)
    if act == "sigmoid":
        # sigmoid(x) = 0.5 * (tanh(x/2) + 1): single EUP op, no VALU divide.
        half = jnp.asarray(0.5, cdt)
        one = jnp.asarray(1.0, cdt)
        return (half * (jnp.tanh(half * xf) + one)).astype(x.dtype)
    if act == "logsigmoid":
        # stable log-sigmoid: min(x, 0) - log1p(exp(-|x|)), then + pixel_max
        zero = jnp.asarray(0.0, cdt)
        y = jnp.minimum(xf, zero) - jnp.log1p(jnp.exp(-jnp.abs(xf)))
        return (y + jnp.asarray(pixel_max, cdt)).astype(x.dtype)
    raise ValueError(f"unknown act: {act}")


def _satlu_kernel(x_ref, o_ref, *, act: str, pixel_max: float):
    o_ref[...] = _satlu_math(x_ref[...], act=act, pixel_max=pixel_max)


def satlu(
    x: jax.Array,
    act: str = "hardtanh",
    pixel_max: float = 1.0,
    *,
    tile_bytes: int = 8 * 1024 * 1024,
) -> jax.Array:
    """SatLU forward. x is NCHW (or any shape); purely elementwise."""
    if act not in ("hardtanh", "sigmoid", "logsigmoid"):
        raise ValueError(f"unknown act: {act}")
    pixel_max = float(pixel_max)

    orig_shape = x.shape
    n = x.size
    if n == 0:
        return x

    flat = x.reshape(-1)
    itemsize = jnp.dtype(x.dtype).itemsize

    # Pick a lane width (multiple of 128) that divides n so the (rows, lane)
    # slab is a zero-copy reshape — no pad/unpad HBM passes.
    lane = next((c for c in _LANE_CANDIDATES if n % c == 0), None)
    if lane is None:
        # Not divisible by 128: kernel handles the lane-aligned bulk, the
        # (<lane)-element tail is done with plain jnp below.
        lane = 128
        n_bulk = (n // lane) * lane
    else:
        n_bulk = n

    if n_bulk == 0:
        # Tensor smaller than one lane row: not worth a kernel launch.
        return _satlu_math(x, act=act, pixel_max=pixel_max)

    rows = n_bulk // lane

    # Dtype-aware row tile targeting ~tile_bytes per block (multiple of 8 rows).
    rows_per_tile = max(8, (tile_bytes // (lane * itemsize)) // 8 * 8)
    if rows <= 16:
        tr = rows  # tiny slab: one block; block dim == full array dim is valid
    else:
        # Always produce >= 2 grid programs so both v7x TensorCores (and their
        # per-TC HBM pipes) get work; round the split to a sublane multiple.
        half = _round_up(pl.cdiv(rows, 2), 8)
        tr = min(rows_per_tile, half)
    grid = (pl.cdiv(rows, tr),)

    x2d = (flat if n_bulk == n else flat[:n_bulk]).reshape(rows, lane)

    flops_per = {"hardtanh": 2, "sigmoid": 3, "logsigmoid": 5}[act]
    trans_per = {"hardtanh": 0, "sigmoid": 1, "logsigmoid": 2}[act]
    cost = pl.CostEstimate(
        flops=flops_per * n_bulk,
        transcendentals=trans_per * n_bulk,
        bytes_accessed=2 * n_bulk * itemsize,
    )

    kernel = functools.partial(_satlu_kernel, act=act, pixel_max=pixel_max)

    out2d = pl.pallas_call(
        kernel,
        out_shape=jax.ShapeDtypeStruct((rows, lane), x.dtype),
        grid=grid,
        in_specs=[pl.BlockSpec((tr, lane), lambda i: (i, 0))],
        out_specs=pl.BlockSpec((tr, lane), lambda i: (i, 0)),
        compiler_params=pltpu.CompilerParams(
            dimension_semantics=("parallel",),
            vmem_limit_bytes=48 * 1024 * 1024,
        ),
        cost_estimate=cost,
    )(x2d)

    out_flat = out2d.reshape(-1)
    if n_bulk != n:
        tail = _satlu_math(flat[n_bulk:], act=act, pixel_max=pixel_max)
        out_flat = jnp.concatenate([out_flat, tail])
    return out_flat.reshape(orig_shape)


def _ref_satlu(x, act, pixel_max):
    xf = x.astype(jnp.float32)
    if act == "hardtanh":
        return jnp.clip(xf, 0.0, pixel_max).astype(x.dtype)
    if act == "sigmoid":
        return jax.nn.sigmoid(xf).astype(x.dtype)
    if act == "logsigmoid":
        return (jax.nn.log_sigmoid(xf) + pixel_max).astype(x.dtype)
    raise ValueError(act)


if __name__ == "__main__":
    key = jax.random.PRNGKey(0)
    pixel_max = 1.0
    ok = True

    # NCHW input (as the PyTorch module would receive from a conv stack), plus
    # an awkward shape that exercises the non-lane-aligned bulk+tail path.
    shapes = [(2, 4, 16, 16), (3, 5, 7, 11)]
    for shape in shapes:
        key, sub = jax.random.split(key)
        x = jax.random.normal(sub, shape, dtype=jnp.float32) * 2.0
        for act in ("hardtanh", "sigmoid", "logsigmoid"):
            out = satlu(x, act=act, pixel_max=pixel_max)
            out = jax.block_until_ready(out)
            ref = _ref_satlu(x, act, pixel_max)
            if not jnp.allclose(out, ref, atol=1e-5, rtol=1e-5):
                ok = False
                print(f"MISMATCH for shape={shape} act={act}: max err "
                      f"{float(jnp.max(jnp.abs(out - ref)))}")

    # bf16 hardtanh exercises the native-dtype clamp path (pixel_max=1.0 is
    # exactly representable in bf16, so this matches the f32 reference exactly).
    key, sub = jax.random.split(key)
    xb = (jax.random.normal(sub, (2, 4, 16, 16), dtype=jnp.float32) * 2.0
          ).astype(jnp.bfloat16)
    outb = jax.block_until_ready(satlu(xb, act="hardtanh", pixel_max=pixel_max))
    refb = _ref_satlu(xb, "hardtanh", pixel_max)
    if not jnp.allclose(outb.astype(jnp.float32), refb.astype(jnp.float32)):
        ok = False
        print("MISMATCH for bf16 hardtanh")

    if ok:
        print("KERNEL_OK")
</pallas_src>

<mosaic_0001>
module attributes {stable_mosaic.version = 11 : i64} {
  func.func @_satlu_kernel(%arg0: i32, %arg1: memref<2x1024xf32, #tpu.memory_space<vmem>>, %arg2: memref<2x1024xf32, #tpu.memory_space<vmem>>) attributes {dimension_semantics = [#tpu.dimension_semantics<parallel>], iteration_bounds = array<i64: 1>, scalar_prefetch = 0 : i64, scratch_operands = 0 : i64, tpu.core_type = #tpu.core_type<tc>, window_params = [{transform_indices = @transform_0, window_bounds = array<i64: 2, 1024>}, {transform_indices = @transform_1, window_bounds = array<i64: 2, 1024>}]} {
    %c0 = arith.constant 0 : index
    %c0_0 = arith.constant 0 : index
    %0 = vector.load %arg1[%c0, %c0_0] : memref<2x1024xf32, #tpu.memory_space<vmem>>, vector<2x1024xf32>
    %cst = arith.constant 0.000000e+00 : f32
    %cst_1 = arith.constant 1.000000e+00 : f32
    %1 = vector.broadcast %cst : f32 to vector<2x1024xf32>
    %2 = arith.maximumf %1, %0 : vector<2x1024xf32>
    %3 = vector.broadcast %cst_1 : f32 to vector<2x1024xf32>
    %4 = arith.minimumf %3, %2 : vector<2x1024xf32>
    %c0_2 = arith.constant 0 : index
    %c0_3 = arith.constant 0 : index
    %5 = vector.load %arg2[%c0_2, %c0_3] : memref<2x1024xf32, #tpu.memory_space<vmem>>, vector<2x1024xf32>
    tpu.vector_store %arg2[%c0_2, %c0_3], %4 {strides = array<i32>} : memref<2x1024xf32, #tpu.memory_space<vmem>>, vector<2x1024xf32>,
    return
  }
  func.func @transform_0(%arg0: i32) -> (i32, i32) {
    %c0_i32 = arith.constant 0 : i32
    %c0_i32_0 = arith.constant 0 : i32
    return %arg0, %c0_i32 : i32, i32
  }
  func.func @transform_1(%arg0: i32) -> (i32, i32) {
    %c0_i32 = arith.constant 0 : i32
    %c0_i32_0 = arith.constant 0 : i32
    return %arg0, %c0_i32 : i32, i32
  }
}

</mosaic_0001>

<bundles_post_ra>
// kernel: tpu_custom_call.1
= control target key start
LH: loop header
LB: loop body
LE: loop exit
PB: predicated region body
PF: predicated region fallthrough
CT: control target
= control target key end

     0   :  { %6 = vsyncpa [#allocation3], 0  ;;  %s130_s0 = inlined_call_operand.hbm [shape: f32[2,1024], index: 0, kind: input, shape index: {}]   ;;  %s131_s1 = inlined_call_operand.hbm [shape: f32[2,1024], index: 1, kind: output, shape index: {}]  }
   0x1   :  { %7 = vsyncpa [#allocation4], 0  ;;  %s94_s6 = smov [#allocation2]   ;;  %s46_s10 = scalar_lea.hbm %s130_s0, 256 }
   0x2   :  { %s14_s7 = sshll.u32 %s94_s6, 4  ;;  %p47_p0 = scmp.ne.s32.totalorder %s130_s0, %s46_s10  ;;  %s15_s7 = int_to_ptr.vmem [resolvable:$true] %s14_s7 }
   0x3   :  { %p50_p1 = scmp.lt.u32.totalorder %s46_s10, %s130_s0 }
   0x5   :  { %p52_p2 = pnand %p50_p1, %p47_p0 }
   0x7   :  { %55 = shalt.err (!%p52_p2)
}
   0x8   :  { %s56_s15 = scalar_lea.vmem %s15_s7, 256  ;;  %p61_p4 = scmp.lt.s32.totalorder %s15_s7, %s15_s7 }
   0x9   :  { %p57_p3 = scmp.ne.s32.totalorder %s15_s7, %s56_s15  ;;  %p62_p5 = scmp.lt.s32.totalorder %s56_s15, %s56_s15 }
   0xb   :  { %p63_p6 = por %p62_p5, %p61_p4 }
   0xd   :  { %p64_p7 = pnand %p63_p6, %p57_p3 }
   0xf   :  { %67 = shalt.err (!%p64_p7)
}
  0x10   :  { %17 = dma.hbm_to_vmem [thread:$0]  %s130_s0, 256, %s15_s7, [#allocation3]  }
  0x11   :  { %90 = dma.done.wait [#allocation3], 256  }
  0x12   :  { %91 = vsyncadd [#allocation3], 4294967040  ;;  %v21_v0 = vld [vmem:[#allocation2] sm:$0xff]  ;;  %v22_v1 = vld [vmem:[#allocation2 + $0x8] sm:$0xff]  ;;  %s95_s18 = smov [#allocation5]  }
  0x13   :  { %s35_s19 = sshll.u32 %s95_s18, 4  ;;  %v23_v2 = vmax.f32 %v21_v0, 0.0  ;;  %v24_v3 = vmax.f32 %v22_v1, 0.0  ;;  %s36_s19 = int_to_ptr.vmem [resolvable:$true] %s35_s19 }
  0x14   :  { %s68_s20 = scalar_lea.vmem %s36_s19, 256  ;;  %p73_p9 = scmp.lt.s32.totalorder %s36_s19, %s36_s19 }
  0x15   :  { %v25_v4 = vmin.f32 %v23_v2, 1.0  ;;  %v26_v5 = vmin.f32 %v24_v3, 1.0  ;;  %p69_p8 = scmp.ne.s32.totalorder %s36_s19, %s68_s20  ;;  %p74_p10 = scmp.lt.s32.totalorder %s68_s20, %s68_s20 }
  0x17   :  { %27 = vst [vmem:[#allocation5] sm:$0xff] %v25_v4  ;;  %28 = vst [vmem:[#allocation5 + $0x8] sm:$0xff] %v26_v5  ;;  %p75_p11 = por %p74_p10, %p73_p9 }
  0x19   :  { %p76_p12 = pnand %p75_p11, %p69_p8 }
  0x1b   :  { %79 = shalt.err (!%p76_p12)
}
  0x1c   :  { %s80_s22 = scalar_lea.hbm %s131_s1, 256 }
  0x1d   :  { %p81_p13 = scmp.ne.s32.totalorder %s131_s1, %s80_s22  ;;  %p84_p0 = scmp.lt.u32.totalorder %s80_s22, %s131_s1 }
  0x1f   :  { %p86_p1 = pnand %p84_p0, %p81_p13 }
  0x21   :  { %89 = shalt.err (!%p86_p1)
}
  0x22   :  { %38 = dma.vmem_to_hbm [thread:$0]  %s36_s19, 256, %s131_s1, [#allocation4]  }
  0x23   :  { %92 = dma.done.wait [#allocation4], 256  }
  0x24   :  { %93 = vsyncadd [#allocation4], 4294967040 }
  0x25   :  { %42 = vsyncpa [#allocation3], 1 }
  0x26   :  { %43 = vsyncpa [#allocation4], 1 }

</bundles_post_ra>
